<compile_context>
chip_gen: v6e
topology: v6e:2x2x1
jax: 0.10.0
libtpu: 0.0.40
codegen_flags: <defaults>
</compile_context>

<pallas_src>
import functools

import numpy as np

import jax
import jax.numpy as jnp
from jax.experimental import pallas as pl
from jax.experimental.pallas import tpu as pltpu


def _pad8(n: int) -> int:
    return ((n + 7) // 8) * 8


# ----------------------------------------------------------------------------
# Roll convention calibration (defensive): the kernel needs shifted[i] = x[i+off].
# pltpu.roll is expected to match jnp.roll; verify once on a tiny kernel so the
# tap shifts are built with the right sign either way.
# ----------------------------------------------------------------------------
def detect_roll_flip() -> bool:
    def kern(x_ref, o_ref):
        o_ref[...] = pltpu.roll(x_ref[...], shift=3, axis=0)

    x = jnp.arange(16 * 128, dtype=jnp.float32).reshape(16, 128)
    y = pl.pallas_call(kern, out_shape=jax.ShapeDtypeStruct((16, 128), jnp.float32))(x)
    same_as_jnp = bool(jnp.array_equal(y, jnp.roll(x, 3, axis=0)))
    return not same_as_jnp


# ----------------------------------------------------------------------------
# One-hot selection matrix implementing: take the valid interior of padded grid 1,
# 2x nearest-upsample it, ReflectionPad2d(1) it, and place it on padded grid 2.
# (Rows for the unused 8-alignment slack stay all-zero.)
# ----------------------------------------------------------------------------
def build_upsample_select(H: int, W: int) -> jnp.ndarray:
    Hv1, Wv1, Hv2, Wv2 = 2 * H, 2 * W, 4 * H, 4 * W
    Hp1, Wp1 = _pad8(Hv1 + 2), _pad8(Wv1 + 2)
    Hp2, Wp2 = _pad8(Hv2 + 2), _pad8(Wv2 + 2)

    def refl(i, n):  # ReflectionPad2d(1) index map
        if i < 0:
            return -i
        if i >= n:
            return 2 * n - 2 - i
        return i

    S = np.zeros((Hp2 * Wp2, Hp1 * Wp1), np.float32)
    for Y in range(Hv2 + 2):
        for X in range(Wv2 + 2):
            sy = refl(Y - 1, Hv2) // 2
            sx = refl(X - 1, Wv2) // 2
            S[Y * Wp2 + X, (sy + 1) * Wp1 + (sx + 1)] = 1.0
    return jnp.asarray(S, jnp.bfloat16)


# ----------------------------------------------------------------------------
# Parameters (deterministic, PyTorch-default-style uniform init), kept in HWIO
# f32 for the pure-JAX reference, plus a prepared kernel-format copy.
# ----------------------------------------------------------------------------
def init_conv_params(key, cin, cout):
    kw, kb = jax.random.split(key)
    bound = 1.0 / (cin * 9) ** 0.5  # fan_in = cin * kh * kw
    w = jax.random.uniform(kw, (3, 3, cin, cout), jnp.float32, -bound, bound)
    b = jax.random.uniform(kb, (cout,), jnp.float32, -bound, bound)
    return w, b


def make_expanding_path_params(out_channels, seed=0):
    key = jax.random.PRNGKey(seed)
    chans = [(128, 64), (64, 64), (64, 32), (32, 16), (16, out_channels)]
    keys = jax.random.split(key, len(chans))
    return [init_conv_params(k, cin, cout) for k, (cin, cout) in zip(keys, chans)]


def prepare_kernel_params(params, out_channels):
    (w0, b0), (w1, b1), (w2, b2), (w3, b3), (w4, b4) = params

    def w9(w):  # (3,3,cin,cout) -> (9,cin,cout) bf16 (MXU operands)
        return w.reshape(9, w.shape[2], w.shape[3]).astype(jnp.bfloat16)

    def b2d(b):  # (cout,) -> (1,cout) f32 (bias/ELU stay f32)
        return b.reshape(1, -1).astype(jnp.float32)

    coutp = max(8, _pad8(out_channels))
    # Final layer kept channel-major: (9, cout_padded, cin)
    w4t = jnp.transpose(w4.reshape(9, w4.shape[2], w4.shape[3]), (0, 2, 1))
    w4t = jnp.pad(w4t, ((0, 0), (0, coutp - out_channels), (0, 0))).astype(jnp.bfloat16)
    b4p = jnp.pad(b4, (0, coutp - out_channels)).reshape(coutp, 1).astype(jnp.float32)

    return {"w0": w9(w0), "b0": b2d(b0), "w1": w9(w1), "b1": b2d(b1),
            "w2": w9(w2), "b2": b2d(b2), "w3": w9(w3), "b3": b2d(b3),
            "w4t": w4t, "b4": b4p}


# ----------------------------------------------------------------------------
# The fused decoder kernel (one grid step per batch element).
# ----------------------------------------------------------------------------
def _decoder_kernel(x_ref, w0_ref, b0_ref, w1_ref, b1_ref, s_ref,
                    w2_ref, b2_ref, w3_ref, b3_ref, w4t_ref, b4_ref,
                    o_ref,
                    acc01, p1, p2, acc2, p3, acc3, p4, acc4,
                    *, H, W, roll_flip):
    f32, bf16 = jnp.float32, jnp.bfloat16
    Hv1, Wv1, Hv2, Wv2 = 2 * H, 2 * W, 4 * H, 4 * W
    Hp1, Wp1, C1 = p1.shape
    Hp2, Wp2, C2 = p2.shape
    C3 = p3.shape[-1]
    C4 = p4.shape[-1]
    Np1, Np2 = Hp1 * Wp1, Hp2 * Wp2
    Cin = x_ref.shape[-1]
    out_ch = o_ref.shape[1]

    def elu(v):  # ELU(alpha=1) in f32
        return jnp.where(v > 0, v, jnp.expm1(v))

    def shifted(x_flat, off, n):
        # shifted[i] = x_flat[i + off]  (wrap-around only touches border/slack rows
        # of the padded grid, which are overwritten / cropped afterwards).
        if off == 0:
            return x_flat
        shift = (off if roll_flip else -off) % n
        return pltpu.roll(x_flat, shift=shift, axis=0)

    def conv3x3(acc_ref, x_flat, w_ref, row_stride):
        # 9 taps = 9 sublane rolls (XLU) + 9 bf16 MXU matmuls into a VMEM f32 acc.
        n = x_flat.shape[0]
        for t in range(9):
            off = (t // 3 - 1) * row_stride + (t % 3 - 1)
            lhs = shifted(x_flat, off, n).astype(bf16)
            c = jnp.dot(lhs, w_ref[t], preferred_element_type=f32)
            if t == 0:
                acc_ref[...] = c
            else:
                acc_ref[...] += c

    def reflect_fix(p_ref, hv, wv):
        # Rebuild the ReflectionPad2d(1) borders of the padded grid from the
        # (freshly computed) valid interior.  Rows first, then columns (corners ok).
        p_ref[0:1, :, :] = p_ref[2:3, :, :]
        p_ref[hv + 1:hv + 2, :, :] = p_ref[hv - 1:hv, :, :]
        p_ref[:, 0:1, :] = p_ref[:, 2:3, :]
        p_ref[:, wv + 1:wv + 2, :] = p_ref[:, wv - 1:wv, :]

    # ---- conv0: Cin(128) -> 64 on padded grid 1 ----
    x0 = x_ref[0].reshape(Np1, Cin)              # free reshape (Wp1 % 8 == 0)
    conv3x3(acc01, x0, w0_ref, Wp1)
    p1[...] = elu(acc01[...] + b0_ref[...]).reshape(Hp1, Wp1, C1)
    reflect_fix(p1, Hv1, Wv1)

    # ---- conv1: 64 -> 64 on padded grid 1 ----
    conv3x3(acc01, p1[...].reshape(Np1, C1), w1_ref, Wp1)
    a1 = elu(acc01[...] + b1_ref[...]).astype(bf16)

    # ---- 2x nearest upsample + ReflectionPad2d(1): one-hot selection matmul ----
    p2[...] = jnp.dot(s_ref[...], a1,
                      preferred_element_type=f32).reshape(Hp2, Wp2, C2)

    # ---- conv2: 64 -> 32 on padded grid 2 ----
    conv3x3(acc2, p2[...].reshape(Np2, C2), w2_ref, Wp2)
    p3[...] = elu(acc2[...] + b2_ref[...]).reshape(Hp2, Wp2, C3)
    reflect_fix(p3, Hv2, Wv2)

    # ---- conv3: 32 -> 16 on padded grid 2 ----
    conv3x3(acc3, p3[...].reshape(Np2, C3), w3_ref, Wp2)
    p4[...] = elu(acc3[...] + b3_ref[...]).reshape(Hp2, Wp2, C4)
    reflect_fix(p4, Hv2, Wv2)

    # ---- conv4: 16 -> out_ch, channel-major acc so the output store is lane-dense
    x4 = p4[...].reshape(Np2, C4)
    dn = (((1,), (1,)), ((), ()))                # contract the cin dims (A @ B.T)
    for t in range(9):
        off = (t // 3 - 1) * Wp2 + (t % 3 - 1)
        rhs = shifted(x4, off, Np2).astype(bf16)
        c = jax.lax.dot_general(w4t_ref[t], rhs, dimension_numbers=dn,
                                preferred_element_type=f32)
        if t == 0:
            acc4[...] = c
        else:
            acc4[...] += c
    y = jnp.clip(acc4[...] + b4_ref[...], -1.0, 1.0)   # (cout_padded, Np2) f32
    o_ref[0] = y[:out_ch, :]                           # (out_ch, Np2), 1600-wide lanes


# ----------------------------------------------------------------------------
# Forward pass (NCHW in, NCHW out) — one pallas_call for the whole decoder.
# ----------------------------------------------------------------------------
def expanding_path(x_nchw, kparams, sel, *, out_channels, roll_flip):
    N, C, H, W = x_nchw.shape
    Hv1, Wv1, Hv2, Wv2 = 2 * H, 2 * W, 4 * H, 4 * W
    Hp1, Wp1 = _pad8(Hv1 + 2), _pad8(Wv1 + 2)
    Hp2, Wp2 = _pad8(Hv2 + 2), _pad8(Wv2 + 2)
    Np2 = Hp2 * Wp2
    coutp = kparams["w4t"].shape[1]

    # Input-side glue (tiny, XLA): NCHW->NHWC, first 2x nearest upsample,
    # ReflectionPad2d(1), zero-extend to the 8-aligned padded grid.
    x = jnp.transpose(x_nchw, (0, 2, 3, 1))
    x = jnp.repeat(jnp.repeat(x, 2, axis=1), 2, axis=2)
    x = jnp.pad(x, ((0, 0), (1, 1), (1, 1), (0, 0)), mode="reflect")
    x = jnp.pad(x, ((0, 0), (0, Hp1 - (Hv1 + 2)), (0, Wp1 - (Wv1 + 2)), (0, 0)))

    kern = functools.partial(_decoder_kernel, H=H, W=W, roll_flip=roll_flip)

    def whole(a):  # full-array block, loaded once (constant across the grid)
        return pl.BlockSpec(a.shape, lambda n: (0,) * a.ndim)

    operands = (x, kparams["w0"], kparams["b0"], kparams["w1"], kparams["b1"], sel,
                kparams["w2"], kparams["b2"], kparams["w3"], kparams["b3"],
                kparams["w4t"], kparams["b4"])
    in_specs = [pl.BlockSpec((1, Hp1, Wp1, C), lambda n: (n, 0, 0, 0))]
    in_specs += [whole(a) for a in operands[1:]]

    out_flat = pl.pallas_call(
        kern,
        out_shape=jax.ShapeDtypeStruct((N, out_channels, Np2), jnp.float32),
        grid=(N,),
        in_specs=in_specs,
        out_specs=pl.BlockSpec((1, out_channels, Np2), lambda n: (n, 0, 0)),
        scratch_shapes=[
            pltpu.VMEM((Hp1 * Wp1, 64), jnp.float32),   # conv0/conv1 accumulator
            pltpu.VMEM((Hp1, Wp1, 64), jnp.float32),    # p1: conv0 out, padded grid 1
            pltpu.VMEM((Hp2, Wp2, 64), jnp.float32),    # p2: upsampled conv1 out, grid 2
            pltpu.VMEM((Np2, 32), jnp.float32),         # conv2 accumulator
            pltpu.VMEM((Hp2, Wp2, 32), jnp.float32),    # p3
            pltpu.VMEM((Np2, 16), jnp.float32),         # conv3 accumulator
            pltpu.VMEM((Hp2, Wp2, 16), jnp.float32),    # p4
            pltpu.VMEM((coutp, Np2), jnp.float32),      # conv4 accumulator (channel-major)
        ],
        compiler_params=pltpu.CompilerParams(
            dimension_semantics=("parallel",),          # v7x: batch over the 2 TCs
            vmem_limit_bytes=48 * 1024 * 1024,
        ),
    )(*operands)

    # Crop the padded grid: (N, out_ch, Hp2*Wp2) -> (N, out_ch, 4H, 4W)  (already NCHW)
    out = out_flat.reshape(N, out_channels, Hp2, Wp2)[:, :, 1:1 + Hv2, 1:1 + Wv2]
    return out


# ----------------------------------------------------------------------------
# Pure-JAX f32 reference (mirrors the PyTorch module) for validation.
# ----------------------------------------------------------------------------
def _conv_block_ref(x, w, b, act):
    xp = jnp.pad(x, ((0, 0), (1, 1), (1, 1), (0, 0)), mode="reflect")
    y = jax.lax.conv_general_dilated(
        xp, w, window_strides=(1, 1), padding="VALID",
        dimension_numbers=("NHWC", "HWIO", "NHWC"),
        precision=jax.lax.Precision.HIGHEST)
    y = y + b.reshape(1, 1, 1, -1)
    if act == "elu":
        y = jnp.where(y > 0, y, jnp.expm1(y))
    return y


def expanding_path_reference(x_nchw, params):
    x = jnp.transpose(x_nchw, (0, 2, 3, 1)).astype(jnp.float32)
    (w0, b0), (w1, b1), (w2, b2), (w3, b3), (w4, b4) = params
    up = lambda v: jnp.repeat(jnp.repeat(v, 2, axis=1), 2, axis=2)
    x = up(x)
    x = _conv_block_ref(x, w0, b0, "elu")
    x = _conv_block_ref(x, w1, b1, "elu")
    x = up(x)
    x = _conv_block_ref(x, w2, b2, "elu")
    x = _conv_block_ref(x, w3, b3, "elu")
    x = _conv_block_ref(x, w4, b4, None)
    x = jnp.clip(x, -1.0, 1.0)
    return jnp.transpose(x, (0, 3, 1, 2))


if __name__ == "__main__":
    out_channels = 3
    N, C, H, W = 2, 128, 8, 8  # small input; output will be (2, 3, 32, 32)

    key = jax.random.PRNGKey(0)
    x = jax.random.normal(key, (N, C, H, W), jnp.float32)

    params = make_expanding_path_params(out_channels, seed=0)
    kparams = prepare_kernel_params(params, out_channels)
    sel = build_upsample_select(H, W)
    roll_flip = detect_roll_flip()

    fwd = jax.jit(functools.partial(
        expanding_path, out_channels=out_channels, roll_flip=roll_flip))
    y = fwd(x, kparams, sel)
    jax.block_until_ready(y)

    assert y.shape == (N, out_channels, 4 * H, 4 * W)
    assert bool(jnp.all(y >= -1.0)) and bool(jnp.all(y <= 1.0))

    # Validate against the pure-JAX f32 reference (bf16 MXU operands -> loose atol).
    y_ref = expanding_path_reference(x, params)
    err = float(jnp.max(jnp.abs(y - y_ref)))
    assert err < 6e-2, f"kernel/reference mismatch: max abs err = {err}"

    print("KERNEL_OK")
</pallas_src>

<mosaic_0001>
module attributes {stable_mosaic.version = 11 : i64} {
  func.func @kern(%arg0: memref<16x128xf32, #tpu.memory_space<vmem>>, %arg1: memref<16x128xf32, #tpu.memory_space<vmem>>) attributes {dimension_semantics = [], scalar_prefetch = 0 : i64, scratch_operands = 0 : i64, tpu.core_type = #tpu.core_type<tc>} {
    %c0 = arith.constant 0 : index
    %c0_0 = arith.constant 0 : index
    %0 = vector.load %arg0[%c0, %c0_0] : memref<16x128xf32, #tpu.memory_space<vmem>>, vector<16x128xf32>
    %c3_i32 = arith.constant 3 : i32
    %1 = tpu.dynamic_rotate %0 by %c3_i32 dim 0 : vector<16x128xf32>, i32 -> vector<16x128xf32>
    %c0_1 = arith.constant 0 : index
    %c0_2 = arith.constant 0 : index
    %2 = vector.load %arg1[%c0_1, %c0_2] : memref<16x128xf32, #tpu.memory_space<vmem>>, vector<16x128xf32>
    tpu.vector_store %arg1[%c0_1, %c0_2], %1 {strides = array<i32>} : memref<16x128xf32, #tpu.memory_space<vmem>>, vector<16x128xf32>,
    return
  }
}

</mosaic_0001>

<bundles_post_ra>
// kernel: tpu_custom_call.1
= control target key start
LH: loop header
LB: loop body
LE: loop exit
PB: predicated region body
PF: predicated region fallthrough
CT: control target
= control target key end

     0   :  { %6 = vsyncpa [#allocation3], 0  ;;  %s119_s0 = inlined_call_operand.hbm [shape: f32[16,128], index: 0, kind: input, shape index: {}]   ;;  %s120_s1 = inlined_call_operand.hbm [shape: f32[16,128], index: 1, kind: output, shape index: {}]  }
   0x1   :  { %7 = vsyncpa [#allocation4], 0  ;;  %s99_s6 = smov [#allocation2]  }
   0x2   :  { %s13_s7 = sshll.u32 %s99_s6, 4  ;;  %s14_s7 = int_to_ptr.vmem [resolvable:$true] %s13_s7 }
   0x3   :  { %s63_s8 = scalar_lea.vmem %s14_s7, 256  ;;  %p68_p1 = scmp.lt.s32.totalorder %s14_s7, %s14_s7 }
   0x4   :  { %p64_p0 = scmp.ne.s32.totalorder %s14_s7, %s63_s8  ;;  %p69_p2 = scmp.lt.s32.totalorder %s63_s8, %s63_s8 }
   0x6   :  { %p70_p3 = por %p69_p2, %p68_p1 }
   0x8   :  { %p71_p4 = pnand %p70_p3, %p64_p0 }
   0xa   :  { %74 = shalt.err (!%p71_p4)
}
   0xb   :  { %s100_s9 = smov 128   ;;  %s101_s10 = smov 8  }
   0xc   :  { %19 = dma.hbm_to_vmem [thread:$0]  %s119_s0, 256, %s14_s7, [#allocation3], %s100_s9, %s100_s9, %s101_s10  }
   0xd   :  { %95 = dma.done.wait [#allocation3], 256  }
   0xe   :  { %96 = vsyncadd [#allocation3], 4294967040  ;;  %v27_v0 = vlaneseq  ;;  %s102_s13 = smov [#allocation5]   ;;  %v23_v2 = vld [vmem:[#allocation2] sm:$0xff]  ;;  %v24_v3 = vld [vmem:[#allocation2 + $0x8] sm:$0xff] }
   0xf   :  { %s39_s14 = sshll.u32 %s102_s13, 4  ;;  %v25_v4 = vrot.slane %v23_v2, 5  ;;  %v26_v5 = vrot.slane %v24_v3, 5  ;;  %s40_s14 = int_to_ptr.vmem [resolvable:$true] %s39_s14 }
  0x10   :  { %v28_v1 = vshrl.u32 %v27_v0, 7  ;;  %s75_s15 = scalar_lea.vmem %s40_s14, 256  ;;  %p80_p6 = scmp.lt.s32.totalorder %s40_s14, %s40_s14 }
  0x11   :  { %p76_p5 = scmp.ne.s32.totalorder %s40_s14, %s75_s15  ;;  %p81_p7 = scmp.lt.s32.totalorder %s75_s15, %s75_s15 }
  0x12   :  { %vm29_vm0 = vcmp.lt.s32.totalorder %v28_v1, 3 }
  0x13   :  { %v31_v6 = vsel %vm29_vm0, %v26_v5, %v25_v4  ;;  %v30_v7 = vsel %vm29_vm0, %v25_v4, %v26_v5  ;;  %p82_p8 = por %p81_p7, %p80_p6 }
  0x14   :  { %32 = vst [vmem:[#allocation5] sm:$0xff] %v31_v6  ;;  %33 = vst [vmem:[#allocation5 + $0x8] sm:$0xff] %v30_v7 }
  0x15   :  { %p83_p9 = pnand %p82_p8, %p76_p5 }
  0x17   :  { %86 = shalt.err (!%p83_p9)
}
  0x18   :  { %45 = dma.vmem_to_hbm [thread:$0]  %s40_s14, 256, %s120_s1, [#allocation4], %s100_s9, %s100_s9, %s101_s10  }
  0x19   :  { %97 = dma.done.wait [#allocation4], 256  }
  0x1a   :  { %98 = vsyncadd [#allocation4], 4294967040 }
  0x1b   :  { %49 = vsyncpa [#allocation3], 1 }
  0x1c   :  { %50 = vsyncpa [#allocation4], 1 }

</bundles_post_ra>
